<compile_context>
chip_gen: v5e
topology: v5e:2x2
jax: 0.10.0
libtpu: 0.0.40
codegen_flags: <defaults>
</compile_context>

<pallas_src>
import functools

import jax
import jax.numpy as jnp
from jax import lax
from jax.experimental import pallas as pl
from jax.experimental.pallas import tpu as pltpu

NEG_SLOPE = 0.01   # nn.LeakyReLU default negative_slope
BN_EPS = 1e-5      # nn.BatchNorm2d default eps


def conv_block_kernel(x_ref, w1_ref, s1_ref, b1_ref, w2_ref, s2_ref, b2_ref,
                      o_ref, *, H):
    # x_ref : (M, Kin)    M = bt*H lane-packed image rows (batch-major)
    # w1_ref: (3, Kin, Kout)   width-banded conv1 taps, one matrix per kh
    # w2_ref: (3, Kout, Kout)  width-banded conv2 taps
    # s*/b* : (1, Kout)        conv-bias + BatchNorm(eval) scale/bias (f32)
    # o_ref : (M, Kout)        lane-dense output
    M, Kout = o_ref.shape

    # 0/1 masks that zero the rows where a +/-1 row shift would wrap across an
    # image (batch) boundary.  Built once per grid step from an iota (VPU).
    r = lax.broadcasted_iota(jnp.int32, (M, Kout), 0) % H
    not_top = (r != 0).astype(jnp.float32)        # kills tap kh=0 on row 0
    not_bot = (r != H - 1).astype(jnp.float32)    # kills tap kh=2 on row H-1

    def conv3x3(x, w_ref):
        # 3 dense MXU matmuls on the UNshifted slab; kh taps combined by
        # rolling the f32 results along sublanes (XLU) + boundary masking.
        # (The kw taps and width zero-padding live inside the banded weights.)
        y0 = jnp.dot(x, w_ref[0], preferred_element_type=jnp.float32)
        y1 = jnp.dot(x, w_ref[1], preferred_element_type=jnp.float32)
        y2 = jnp.dot(x, w_ref[2], preferred_element_type=jnp.float32)
        up = not_top * pltpu.roll(y0, 1, 0)        # out[i] += y0[i-1]
        dn = not_bot * pltpu.roll(y2, M - 1, 0)    # out[i] += y2[i+1]
        return y1 + up + dn

    h = conv3x3(x_ref[...], w1_ref)
    h = h * s1_ref[...] + b1_ref[...]              # conv bias + BN (eval), f32
    h = jnp.maximum(h, NEG_SLOPE * h)              # LeakyReLU (single vmax)
    # TODO(synk): Dropout is identity and BN uses running stats (eval-mode);
    # training-mode dropout masks / batch statistics are not reproduced.

    y = conv3x3(h.astype(w2_ref.dtype), w2_ref)    # cast once for 2nd MXU pass
    y = y * s2_ref[...] + b2_ref[...]
    y = jnp.maximum(y, NEG_SLOPE * y)
    o_ref[...] = y.astype(o_ref.dtype)             # dense (M, 128) store


def _band_weights(wt, W):
    """torch conv weight (Cout, Cin, 3, 3) -> (3, W*Cin, W*Cout) block-tridiag.

    out[kh, w_in*Cin+ci, w_out*Cout+co] = wt[co, ci, kh, w_in - w_out + 1]
    when |w_in - w_out| <= 1, else 0.  The band encodes the kw taps and the
    'same'-padding zeros along width.
    """
    Cout_, Cin_ = wt.shape[0], wt.shape[1]
    tap = jnp.transpose(wt, (2, 3, 1, 0))                 # (3, 3, Cin, Cout)
    w_in = jnp.arange(W)[:, None]
    w_out = jnp.arange(W)[None, :]
    dw = w_in - w_out                                     # (W, W)
    dw_c = jnp.clip(dw + 1, 0, 2)
    gathered = tap[:, dw_c]                               # (3, W, W, Cin, Cout)
    mask = (jnp.abs(dw) <= 1)[None, :, :, None, None]
    banded = jnp.where(mask, gathered, 0.0)               # (3, W, W, Cin, Cout)
    banded = jnp.transpose(banded, (0, 1, 3, 2, 4))       # (3, W, Cin, W, Cout)
    return banded.reshape(3, W * Cin_, W * Cout_).astype(jnp.float32)


def _fuse_bn(conv_bias, gamma, beta, running_mean, running_var, W):
    scale = gamma / jnp.sqrt(running_var + BN_EPS)
    bias = beta + scale * (conv_bias - running_mean)
    s_lane = jnp.tile(scale, W).reshape(1, -1).astype(jnp.float32)  # (1, W*Cout)
    b_lane = jnp.tile(bias, W).reshape(1, -1).astype(jnp.float32)
    return s_lane, b_lane


def _pad_cin(Cin, W):
    """Pad Cin so W*Cin is a multiple of 128 when possible (free compute)."""
    lane = W * Cin
    if lane % 128 == 0:
        return Cin
    target = ((lane + 127) // 128) * 128
    if target % W == 0:
        return target // W
    return Cin


def conv_block_forward(x_nchw, p, *, batch_tile=1, compute_dtype=jnp.bfloat16):
    """x_nchw: (N, Cin, H, W) float32 (PyTorch layout). Returns (N, Cout, H, W).

    batch_tile folds `batch_tile` images into the matmul M dimension per grid
    step (M = batch_tile*H).  For large N pick it so M ~ 128-256 and the grid
    keeps >= 4 steps (>= 2 per core on v7x) for DMA/compute overlap.
    """
    N, Cin, H, W = x_nchw.shape
    Cout = p["w1"].shape[0]
    assert N % batch_tile == 0
    bt = batch_tile

    # Lane-density: zero-pad Cin (zero channels contribute nothing).
    Cin_p = _pad_cin(Cin, W)
    Kin, Kout = W * Cin_p, W * Cout
    M = bt * H

    # NCHW -> lane-packed row-major slab (N*H, W*Cin_p).  No H padding: the kh
    # taps are applied by rolling the matmul results inside the kernel.
    x = jnp.transpose(x_nchw, (0, 2, 3, 1))                # (N, H, W, Cin)
    if Cin_p != Cin:
        x = jnp.pad(x, ((0, 0), (0, 0), (0, 0), (0, Cin_p - Cin)))
    x = x.reshape(N * H, Kin).astype(compute_dtype)

    w1 = p["w1"]
    if Cin_p != Cin:
        w1 = jnp.pad(w1, ((0, 0), (0, Cin_p - Cin), (0, 0), (0, 0)))
    w1b = _band_weights(w1, W).astype(compute_dtype)       # (3, Kin,  Kout)
    w2b = _band_weights(p["w2"], W).astype(compute_dtype)  # (3, Kout, Kout)
    s1, b1 = _fuse_bn(p["b1"], p["g1"], p["be1"], p["rm1"], p["rv1"], W)
    s2, b2 = _fuse_bn(p["b2"], p["g2"], p["be2"], p["rm2"], p["rv2"], W)

    kernel = functools.partial(conv_block_kernel, H=H)
    out = pl.pallas_call(
        kernel,
        out_shape=jax.ShapeDtypeStruct((N * H, Kout), jnp.float32),
        grid_spec=pltpu.PrefetchScalarGridSpec(
            num_scalar_prefetch=0,
            grid=(N // bt,),
            in_specs=[
                pl.BlockSpec((M, Kin), lambda n: (n, 0)),
                pl.BlockSpec((3, Kin, Kout), lambda n: (0, 0, 0)),
                pl.BlockSpec((1, Kout), lambda n: (0, 0)),
                pl.BlockSpec((1, Kout), lambda n: (0, 0)),
                pl.BlockSpec((3, Kout, Kout), lambda n: (0, 0, 0)),
                pl.BlockSpec((1, Kout), lambda n: (0, 0)),
                pl.BlockSpec((1, Kout), lambda n: (0, 0)),
            ],
            out_specs=pl.BlockSpec((M, Kout), lambda n: (n, 0)),
        ),
        compiler_params=pltpu.CompilerParams(
            dimension_semantics=("parallel",)),
    )(x, w1b, s1, b1, w2b, s2, b2)

    out = out.reshape(N, H, W, Cout)
    return jnp.transpose(out, (0, 3, 1, 2))                # -> NCHW


def conv_block_ref(x_nchw, p):
    """Pure-JAX reference (eval-mode semantics), NCHW in / NCHW out."""
    x = jnp.transpose(x_nchw, (0, 2, 3, 1))

    def conv(x, w, b):
        w_hwio = jnp.transpose(w, (2, 3, 1, 0))
        y = lax.conv_general_dilated(x, w_hwio, (1, 1), ((1, 1), (1, 1)),
                                     dimension_numbers=("NHWC", "HWIO", "NHWC"))
        return y + b

    def bn(x, g, be, rm, rv):
        return (x - rm) / jnp.sqrt(rv + BN_EPS) * g + be

    def lrelu(x):
        return jnp.where(x >= 0, x, NEG_SLOPE * x)

    h = lrelu(bn(conv(x, p["w1"], p["b1"]), p["g1"], p["be1"], p["rm1"], p["rv1"]))
    y = lrelu(bn(conv(h, p["w2"], p["b2"]), p["g2"], p["be2"], p["rm2"], p["rv2"]))
    return jnp.transpose(y, (0, 3, 1, 2))


if __name__ == "__main__":
    key = jax.random.PRNGKey(0)
    N, Cin, Cout, H, W = 2, 4, 8, 16, 16       # ConvBlock(in=4, out=8, dropout_p=0.1)
    ks = jax.random.split(key, 5)

    params = {
        "w1": 0.1 * jax.random.normal(ks[0], (Cout, Cin, 3, 3), jnp.float32),
        "b1": 0.1 * jax.random.normal(ks[1], (Cout,), jnp.float32),
        "g1": jnp.ones((Cout,), jnp.float32),
        "be1": jnp.zeros((Cout,), jnp.float32),
        "rm1": jnp.zeros((Cout,), jnp.float32),
        "rv1": jnp.ones((Cout,), jnp.float32),
        "w2": 0.1 * jax.random.normal(ks[2], (Cout, Cout, 3, 3), jnp.float32),
        "b2": 0.1 * jax.random.normal(ks[3], (Cout,), jnp.float32),
        "g2": jnp.ones((Cout,), jnp.float32),
        "be2": jnp.zeros((Cout,), jnp.float32),
        "rm2": jnp.zeros((Cout,), jnp.float32),
        "rv2": jnp.ones((Cout,), jnp.float32),
    }

    x = jax.random.normal(ks[4], (N, Cin, H, W), jnp.float32)
    y_ref = conv_block_ref(x, params)

    # bf16 path (v6e/v7x-preferred): grid=(2,), two parallel steps, M=16.
    y_bf16 = jax.block_until_ready(
        conv_block_forward(x, params, batch_tile=1, compute_dtype=jnp.bfloat16))
    assert y_bf16.shape == (N, Cout, H, W), y_bf16.shape
    assert jnp.allclose(y_bf16, y_ref, atol=3e-2, rtol=3e-2), \
        float(jnp.abs(y_bf16 - y_ref).max())

    # f32 path, batch folded into M (M=32, grid=(1,)) — exactness check.
    y_f32 = jax.block_until_ready(
        conv_block_forward(x, params, batch_tile=2, compute_dtype=jnp.float32))
    assert jnp.allclose(y_f32, y_ref, atol=1e-4, rtol=1e-4), \
        float(jnp.abs(y_f32 - y_ref).max())

    print("KERNEL_OK")
</pallas_src>

<mosaic_0001>
module attributes {stable_mosaic.version = 11 : i64} {
  func.func @conv_block_kernel(%arg0: i32, %arg1: memref<16x128xbf16, #tpu.memory_space<vmem>>, %arg2: memref<3x128x128xbf16, #tpu.memory_space<vmem>>, %arg3: memref<1x128xf32, #tpu.memory_space<vmem>>, %arg4: memref<1x128xf32, #tpu.memory_space<vmem>>, %arg5: memref<3x128x128xbf16, #tpu.memory_space<vmem>>, %arg6: memref<1x128xf32, #tpu.memory_space<vmem>>, %arg7: memref<1x128xf32, #tpu.memory_space<vmem>>, %arg8: memref<16x128xf32, #tpu.memory_space<vmem>>) attributes {dimension_semantics = [#tpu.dimension_semantics<parallel>], iteration_bounds = array<i64: 2>, scalar_prefetch = 0 : i64, scratch_operands = 0 : i64, tpu.core_type = #tpu.core_type<tc>, window_params = [{transform_indices = @transform_0, window_bounds = array<i64: 16, 128>}, {pipeline_mode = #tpu.pipeline_mode<synchronous>, transform_indices = @transform_1, window_bounds = array<i64: 3, 128, 128>}, {pipeline_mode = #tpu.pipeline_mode<synchronous>, transform_indices = @transform_2, window_bounds = array<i64: 1, 128>}, {pipeline_mode = #tpu.pipeline_mode<synchronous>, transform_indices = @transform_3, window_bounds = array<i64: 1, 128>}, {pipeline_mode = #tpu.pipeline_mode<synchronous>, transform_indices = @transform_4, window_bounds = array<i64: 3, 128, 128>}, {pipeline_mode = #tpu.pipeline_mode<synchronous>, transform_indices = @transform_5, window_bounds = array<i64: 1, 128>}, {pipeline_mode = #tpu.pipeline_mode<synchronous>, transform_indices = @transform_6, window_bounds = array<i64: 1, 128>}, {transform_indices = @transform_7, window_bounds = array<i64: 16, 128>}]} {
    %0 = tpu.iota {dimensions = array<i32: 0>} : vector<16x128xi32>
    %c16_i32 = arith.constant 16 : i32
    %c0_i32 = arith.constant 0 : i32
    %1 = arith.cmpi eq, %c16_i32, %c0_i32 : i32
    %c1_i32 = arith.constant 1 : i32
    %2 = arith.select %1, %c1_i32, %c16_i32 : i32
    %3 = vector.broadcast %2 : i32 to vector<16x128xi32>
    %4 = arith.remsi %0, %3 : vector<16x128xi32>
    %c0_i32_0 = arith.constant 0 : i32
    %5 = vector.broadcast %c0_i32_0 : i32 to vector<16x128xi32>
    %6 = arith.cmpi ne, %4, %5 : vector<16x128xi32>
    %c0_i32_1 = arith.constant 0 : i32
    %7 = vector.broadcast %c0_i32_1 : i32 to vector<16x128xi32>
    %8 = arith.cmpi slt, %4, %7 : vector<16x128xi32>
    %c0_i32_2 = arith.constant 0 : i32
    %9 = arith.cmpi slt, %2, %c0_i32_2 : i32
    %10 = vector.broadcast %9 : i1 to vector<16x128xi1>
    %11 = vector.broadcast %10 : vector<16x128xi1> to vector<16x128xi1>
    %12 = arith.xori %8, %11 : vector<16x128xi1>
    %13 = arith.andi %12, %6 : vector<16x128xi1>
    %14 = vector.broadcast %2 : i32 to vector<16x128xi32>
    %15 = arith.addi %4, %14 : vector<16x128xi32>
    %16 = arith.select %13, %15, %4 : vector<16x128xi1>, vector<16x128xi32>
    %c0_i32_3 = arith.constant 0 : i32
    %17 = vector.broadcast %c0_i32_3 : i32 to vector<16x128xi32>
    %18 = arith.cmpi ne, %16, %17 : vector<16x128xi32>
    %19 = arith.extui %18 : vector<16x128xi1> to vector<16x128xi32>
    %20 = arith.sitofp %19 : vector<16x128xi32> to vector<16x128xf32>
    %c15_i32 = arith.constant 15 : i32
    %21 = vector.broadcast %c15_i32 : i32 to vector<16x128xi32>
    %22 = arith.cmpi ne, %16, %21 : vector<16x128xi32>
    %23 = arith.extui %22 : vector<16x128xi1> to vector<16x128xi32>
    %24 = arith.sitofp %23 : vector<16x128xi32> to vector<16x128xf32>
    %c0 = arith.constant 0 : index
    %c0_4 = arith.constant 0 : index
    %25 = vector.load %arg1[%c0, %c0_4] : memref<16x128xbf16, #tpu.memory_space<vmem>>, vector<16x128xbf16>
    %c0_5 = arith.constant 0 : index
    %c0_6 = arith.constant 0 : index
    %c0_7 = arith.constant 0 : index
    %26 = vector.load %arg2[%c0_5, %c0_6, %c0_7] : memref<3x128x128xbf16, #tpu.memory_space<vmem>>, vector<1x128x128xbf16>
    %27 = vector.shape_cast %26 : vector<1x128x128xbf16> to vector<128x128xbf16>
    %cst = arith.constant dense<0.000000e+00> : vector<16x128xf32>
    %28 = tpu.matmul %25, %27, %cst {dimension_numbers = #tpu.dot_dimension_numbers<[1], [0], [0], [1], [0, 0, 1, 1], [], []>} : vector<16x128xbf16>, vector<128x128xbf16>, vector<16x128xf32> -> vector<16x128xf32>
    %c1 = arith.constant 1 : index
    %c0_8 = arith.constant 0 : index
    %c0_9 = arith.constant 0 : index
    %29 = vector.load %arg2[%c1, %c0_8, %c0_9] : memref<3x128x128xbf16, #tpu.memory_space<vmem>>, vector<1x128x128xbf16>
    %30 = vector.shape_cast %29 : vector<1x128x128xbf16> to vector<128x128xbf16>
    %cst_10 = arith.constant dense<0.000000e+00> : vector<16x128xf32>
    %31 = tpu.matmul %25, %30, %cst_10 {dimension_numbers = #tpu.dot_dimension_numbers<[1], [0], [0], [1], [0, 0, 1, 1], [], []>} : vector<16x128xbf16>, vector<128x128xbf16>, vector<16x128xf32> -> vector<16x128xf32>
    %c2 = arith.constant 2 : index
    %c0_11 = arith.constant 0 : index
    %c0_12 = arith.constant 0 : index
    %32 = vector.load %arg2[%c2, %c0_11, %c0_12] : memref<3x128x128xbf16, #tpu.memory_space<vmem>>, vector<1x128x128xbf16>
    %33 = vector.shape_cast %32 : vector<1x128x128xbf16> to vector<128x128xbf16>
    %cst_13 = arith.constant dense<0.000000e+00> : vector<16x128xf32>
    %34 = tpu.matmul %25, %33, %cst_13 {dimension_numbers = #tpu.dot_dimension_numbers<[1], [0], [0], [1], [0, 0, 1, 1], [], []>} : vector<16x128xbf16>, vector<128x128xbf16>, vector<16x128xf32> -> vector<16x128xf32>
    %c1_i32_14 = arith.constant 1 : i32
    %35 = tpu.dynamic_rotate %28 by %c1_i32_14 dim 0 : vector<16x128xf32>, i32 -> vector<16x128xf32>
    %36 = arith.mulf %20, %35 : vector<16x128xf32>
    %c15_i32_15 = arith.constant 15 : i32
    %37 = tpu.dynamic_rotate %34 by %c15_i32_15 dim 0 : vector<16x128xf32>, i32 -> vector<16x128xf32>
    %38 = arith.mulf %24, %37 : vector<16x128xf32>
    %39 = arith.addf %31, %36 : vector<16x128xf32>
    %40 = arith.addf %39, %38 : vector<16x128xf32>
    %c0_16 = arith.constant 0 : index
    %c0_17 = arith.constant 0 : index
    %41 = vector.load %arg3[%c0_16, %c0_17] : memref<1x128xf32, #tpu.memory_space<vmem>>, vector<1x128xf32>
    %42 = vector.broadcast %41 : vector<1x128xf32> to vector<16x128xf32>
    %43 = arith.mulf %40, %42 : vector<16x128xf32>
    %c0_18 = arith.constant 0 : index
    %c0_19 = arith.constant 0 : index
    %44 = vector.load %arg4[%c0_18, %c0_19] : memref<1x128xf32, #tpu.memory_space<vmem>>, vector<1x128xf32>
    %45 = vector.broadcast %44 : vector<1x128xf32> to vector<16x128xf32>
    %46 = arith.addf %43, %45 : vector<16x128xf32>
    %cst_20 = arith.constant 0.00999999977 : f32
    %47 = vector.broadcast %cst_20 : f32 to vector<16x128xf32>
    %48 = arith.mulf %47, %46 : vector<16x128xf32>
    %49 = arith.maximumf %46, %48 : vector<16x128xf32>
    %50 = arith.truncf %49 : vector<16x128xf32> to vector<16x128xbf16>
    %c0_21 = arith.constant 0 : index
    %c0_22 = arith.constant 0 : index
    %c0_23 = arith.constant 0 : index
    %51 = vector.load %arg5[%c0_21, %c0_22, %c0_23] : memref<3x128x128xbf16, #tpu.memory_space<vmem>>, vector<1x128x128xbf16>
    %52 = vector.shape_cast %51 : vector<1x128x128xbf16> to vector<128x128xbf16>
    %cst_24 = arith.constant dense<0.000000e+00> : vector<16x128xf32>
    %53 = tpu.matmul %50, %52, %cst_24 {dimension_numbers = #tpu.dot_dimension_numbers<[1], [0], [0], [1], [0, 0, 1, 1], [], []>} : vector<16x128xbf16>, vector<128x128xbf16>, vector<16x128xf32> -> vector<16x128xf32>
    %c1_25 = arith.constant 1 : index
    %c0_26 = arith.constant 0 : index
    %c0_27 = arith.constant 0 : index
    %54 = vector.load %arg5[%c1_25, %c0_26, %c0_27] : memref<3x128x128xbf16, #tpu.memory_space<vmem>>, vector<1x128x128xbf16>
    %55 = vector.shape_cast %54 : vector<1x128x128xbf16> to vector<128x128xbf16>
    %cst_28 = arith.constant dense<0.000000e+00> : vector<16x128xf32>
    %56 = tpu.matmul %50, %55, %cst_28 {dimension_numbers = #tpu.dot_dimension_numbers<[1], [0], [0], [1], [0, 0, 1, 1], [], []>} : vector<16x128xbf16>, vector<128x128xbf16>, vector<16x128xf32> -> vector<16x128xf32>
    %c2_29 = arith.constant 2 : index
    %c0_30 = arith.constant 0 : index
    %c0_31 = arith.constant 0 : index
    %57 = vector.load %arg5[%c2_29, %c0_30, %c0_31] : memref<3x128x128xbf16, #tpu.memory_space<vmem>>, vector<1x128x128xbf16>
    %58 = vector.shape_cast %57 : vector<1x128x128xbf16> to vector<128x128xbf16>
    %cst_32 = arith.constant dense<0.000000e+00> : vector<16x128xf32>
    %59 = tpu.matmul %50, %58, %cst_32 {dimension_numbers = #tpu.dot_dimension_numbers<[1], [0], [0], [1], [0, 0, 1, 1], [], []>} : vector<16x128xbf16>, vector<128x128xbf16>, vector<16x128xf32> -> vector<16x128xf32>
    %c1_i32_33 = arith.constant 1 : i32
    %60 = tpu.dynamic_rotate %53 by %c1_i32_33 dim 0 : vector<16x128xf32>, i32 -> vector<16x128xf32>
    %61 = arith.mulf %20, %60 : vector<16x128xf32>
    %c15_i32_34 = arith.constant 15 : i32
    %62 = tpu.dynamic_rotate %59 by %c15_i32_34 dim 0 : vector<16x128xf32>, i32 -> vector<16x128xf32>
    %63 = arith.mulf %24, %62 : vector<16x128xf32>
    %64 = arith.addf %56, %61 : vector<16x128xf32>
    %65 = arith.addf %64, %63 : vector<16x128xf32>
    %c0_35 = arith.constant 0 : index
    %c0_36 = arith.constant 0 : index
    %66 = vector.load %arg6[%c0_35, %c0_36] : memref<1x128xf32, #tpu.memory_space<vmem>>, vector<1x128xf32>
    %67 = vector.broadcast %66 : vector<1x128xf32> to vector<16x128xf32>
    %68 = arith.mulf %65, %67 : vector<16x128xf32>
    %c0_37 = arith.constant 0 : index
    %c0_38 = arith.constant 0 : index
    %69 = vector.load %arg7[%c0_37, %c0_38] : memref<1x128xf32, #tpu.memory_space<vmem>>, vector<1x128xf32>
    %70 = vector.broadcast %69 : vector<1x128xf32> to vector<16x128xf32>
    %71 = arith.addf %68, %70 : vector<16x128xf32>
    %cst_39 = arith.constant 0.00999999977 : f32
    %72 = vector.broadcast %cst_39 : f32 to vector<16x128xf32>
    %73 = arith.mulf %72, %71 : vector<16x128xf32>
    %74 = arith.maximumf %71, %73 : vector<16x128xf32>
    %c0_40 = arith.constant 0 : index
    %c0_41 = arith.constant 0 : index
    %75 = vector.load %arg8[%c0_40, %c0_41] : memref<16x128xf32, #tpu.memory_space<vmem>>, vector<16x128xf32>
    tpu.vector_store %arg8[%c0_40, %c0_41], %74 {strides = array<i32>} : memref<16x128xf32, #tpu.memory_space<vmem>>, vector<16x128xf32>,
    return
  }
  func.func @transform_0(%arg0: i32) -> (i32, i32) {
    %c0_i32 = arith.constant 0 : i32
    %c0_i32_0 = arith.constant 0 : i32
    return %arg0, %c0_i32 : i32, i32
  }
  func.func @transform_1(%arg0: i32) -> (i32, i32, i32) {
    %c0_i32 = arith.constant 0 : i32
    %c0_i32_0 = arith.constant 0 : i32
    %c0_i32_1 = arith.constant 0 : i32
    %c0_i32_2 = arith.constant 0 : i32
    return %c0_i32, %c0_i32_0, %c0_i32_1 : i32, i32, i32
  }
  func.func @transform_2(%arg0: i32) -> (i32, i32) {
    %c0_i32 = arith.constant 0 : i32
    %c0_i32_0 = arith.constant 0 : i32
    %c0_i32_1 = arith.constant 0 : i32
    return %c0_i32, %c0_i32_0 : i32, i32
  }
  func.func @transform_3(%arg0: i32) -> (i32, i32) {
    %c0_i32 = arith.constant 0 : i32
    %c0_i32_0 = arith.constant 0 : i32
    %c0_i32_1 = arith.constant 0 : i32
    return %c0_i32, %c0_i32_0 : i32, i32
  }
  func.func @transform_4(%arg0: i32) -> (i32, i32, i32) {
    %c0_i32 = arith.constant 0 : i32
    %c0_i32_0 = arith.constant 0 : i32
    %c0_i32_1 = arith.constant 0 : i32
    %c0_i32_2 = arith.constant 0 : i32
    return %c0_i32, %c0_i32_0, %c0_i32_1 : i32, i32, i32
  }
  func.func @transform_5(%arg0: i32) -> (i32, i32) {
    %c0_i32 = arith.constant 0 : i32
    %c0_i32_0 = arith.constant 0 : i32
    %c0_i32_1 = arith.constant 0 : i32
    return %c0_i32, %c0_i32_0 : i32, i32
  }
  func.func @transform_6(%arg0: i32) -> (i32, i32) {
    %c0_i32 = arith.constant 0 : i32
    %c0_i32_0 = arith.constant 0 : i32
    %c0_i32_1 = arith.constant 0 : i32
    return %c0_i32, %c0_i32_0 : i32, i32
  }
  func.func @transform_7(%arg0: i32) -> (i32, i32) {
    %c0_i32 = arith.constant 0 : i32
    %c0_i32_0 = arith.constant 0 : i32
    return %arg0, %c0_i32 : i32, i32
  }
}

</mosaic_0001>

<bundles_post_ra>
// kernel: tpu_custom_call.1
= control target key start
LH: loop header
LB: loop body
LE: loop exit
PB: predicated region body
PF: predicated region fallthrough
CT: control target
= control target key end

     0   :  { %s1766_s0 = inlined_call_operand.hbm [shape: bf16[32,128], index: 0, kind: input, shape index: {}]   ;;  %s1767_s1 = inlined_call_operand.hbm [shape: bf16[3,128,128], index: 1, kind: input, shape index: {}]   ;;  %s1768_s2 = inlined_call_operand.vmem [shape: f32[1,128], index: 2, kind: input, shape index: {}]   ;;  %s1769_s3 = inlined_call_operand.vmem [shape: f32[1,128], index: 3, kind: input, shape index: {}]   ;;  %s1770_s4 = inlined_call_operand.hbm [shape: bf16[3,128,128], index: 4, kind: input, shape index: {}]   ;;  %s1771_s5 = inlined_call_operand.vmem [shape: f32[1,128], index: 5, kind: input, shape index: {}]   ;;  %s1772_s6 = inlined_call_operand.vmem [shape: f32[1,128], index: 6, kind: input, shape index: {}]   ;;  %s1773_s7 = inlined_call_operand.hbm [shape: f32[32,128], index: 7, kind: output, shape index: {}]  }
   0x1   :  { %1776 = sst [smem:[#allocation12_spill]] %s1767_s1 }
   0x2   :  { %12 = vsyncpa [#allocation3], 0 }
   0x3   :  { %14 = vsyncpa [#allocation3 + $0x1], 0 }
   0x4   :  { %15 = vsyncpa [#allocation6], 0 }
   0x5   :  { %16 = vsyncpa [#allocation4], 0 }
   0x6   :  { %18 = vsyncpa [#allocation4 + $0x1], 0  ;;  %s1578_s24 = smov 0   ;;  %s1580_s25 = smov 0  }
   0x7   :  { %s1582_s26 = smov 0   ;;  %s1584_s27 = smov 0  }
   0x8 LB: > { %s1599_s28 = sadd.s32 4294967295, %s1529_s27   ;;  %s1026_s29 = sadd.s32 4294967294, %s1529_s27   ;;  %s1529_s27 = sphi %s1584_s27, %s1789_s27   ;;  %s1525_s26 = sphi %s1582_s26, %s1788_s26   ;;  %s1521_s25 = sphi %s1580_s25, %s1787_s25   ;;  %s1517_s24 = sphi %s1578_s24, %s1786_s24  }
   0x9   : > { %p44_p0 = scmp.ne.s32.totalorder %s1521_s25, %s1517_s24  ;;  %p45_p1 = scmp.eq.s32.totalorder %s1599_s28, 0 }
   0xa   : > { %p194_p2 = scmp.eq.s32.totalorder %s1599_s28, 1  ;;  %p200_p3 = scmp.eq.s32.totalorder %s1026_s29, 1 }
   0xb   : > { %p1608_p4 = por %p45_p1, %p44_p0  ;;  %p1027_p5 = scmp.ge.s32.totalorder %s1529_s27, 1 }
   0xc   : > { %p1613_p6 = por %p200_p3, %p44_p0  ;;  %p207_p7 = scmp.lt.s32.totalorder %s1529_s27, 3 }
   0xd   : > { %s1779_s1 = sld [smem:[#allocation12_spill]]  ;;  %s1531_s13 = smov [#allocation5]  }
   0xe   : > { %p1621_p8 = pnand %p1027_p5, %p207_p7  ;;  %s220_s14 = sshll.u32 %s1531_s13, 4  ;;  %s221_s14 = int_to_ptr.vmem [resolvable:$true] %s220_s14 }
   0xf   : > { %s238_s17 = sshll.u32 %s1770_s4, 4  ;;  %s1774_s18 = smov 64   ;;  %s239_s17 = int_to_ptr.hbm [resolvable:$true] %s238_s17 }
  0x10   : > { %p1305_p9 = pneg %p1621_p8  ;;  %s1775_s19 = smov 4  }
  0x11   : > { %s1534_s20 = smov [#allocation7]   ;;  %s1640_s22 = sadd.s32 1, %s1529_s27  }
  0x12   : > { %p1306_p10 = pnand %p1305_p9, %p45_p1  ;;  %s240_s21 = sshll.u32 %s1534_s20, 4  ;;  %s241_s21 = int_to_ptr.vmem [resolvable:$true] %s240_s21 }
  0x13   : > { %s218_s11 = sshll.u32 %s1779_s1, 4  ;;  %s31_s23 = sadd.s32 1, %s1525_s26  ;;  %s219_s11 = int_to_ptr.hbm [resolvable:$true] %s218_s11 }
  0x14   : > { %1308 = dma.hbm_to_vmem [thread:$0]  (!%p1306_p10), %s219_s11, 3072, %s221_s14, [#allocation6], %s1774_s18, %s1774_s18, %s1775_s19  }
  0x15   : > { %1311 = dma.hbm_to_vmem [thread:$0]  (!%p1306_p10), %s239_s17, 3072, %s241_s21, [#allocation6], %s1774_s18, %s1774_s18, %s1775_s19  }
  0x16   : > { %s28_s29 = ssub.s32 %s1529_s27, %s1640_s22  ;;  %p38_p12 = scmp.ne.s32.totalorder %s1525_s26, %s1521_s25 }
  0x17   : > { %p29_p13 = scmp.eq.s32.totalorder %s28_s29, 0  ;;  %p39_p0 = scmp.eq.s32.totalorder %s1529_s27, 0 }
  0x18   : > { %p1650_p3 = por %p194_p2, %p38_p12  ;;  %p1322_p5 = scmp.lt.s32.totalorder %s1529_s27, 2 }
  0x19   : > { %s1656_s10 = scalar_select %p29_p13, %s1525_s26, %s31_s23  }
  0x1a   : > { %p40_p7 = por %p39_p0, %p38_p12  ;;  %s260_s11 = sand.u32 1, %s1525_s26  }
  0x1b   : > { %s1031_s13 = sshll.u32 %s260_s11, 3  ;;  %s1242_s14 = sshll.u32 %s1529_s27, 3 }
  0x1c   : > { %s269_s17 = scalar_lea.hbm %s1766_s0, %s1242_s14  ;;  %s264_s20 = scalar_lea.vmem [#allocation2], %s1031_s13 }
  0x1d   : > { %s272_s21 = sshll.u32 %s264_s20, 4  ;;  %s270_s29 = sshll.u32 %s269_s17, 4  ;;  %s273_s21 = int_to_ptr.vmem [resolvable:$true] %s272_s21  ;;  %s271_s29 = int_to_ptr.hbm [resolvable:$true] %s270_s29 }
  0x1e   : > { %p1663_p2 = pnand %p1322_p5, %p40_p7  ;;  %s261_s23 = scalar_lea.sflag [#allocation3], %s260_s11 }
  0x1f   : > { %s1429_s19 = sshra.s32 %s271_s29, 4  ;;  %s1436_s15 = scalar_lea.hbm %s1766_s0, 16  ;;  %s1430_s19 = int_to_ptr.hbm [resolvable:$true] %s1429_s19 }
  0x20   : > { %s1431_s1 = scalar_lea.hbm %s1430_s19, 8  ;;  %p1433_p10 = pneg %p1663_p2 }
  0x21   : > { %p1432_p9 = scmp.ne.s32.totalorder %s1430_s19, %s1431_s1  ;;  %p1437_p0 = scmp.lt.s32.totalorder %s1430_s19, %s1766_s0 }
  0x22   : > { %p1438_p5 = scmp.lt.s32.totalorder %s1436_s15, %s1431_s1 }
  0x23   : > { %p1434_p12 = pnand %p1433_p10, %p1432_p9 }
  0x24   : > { %p1439_p7 = por %p1438_p5, %p1437_p0 }
  0x25   : > { %p1435_p13 = pneg %p1434_p12 }
  0x27   : > { %p1440_p11 = pnand %p1439_p7, %p1435_p13 }
  0x29   : > { %1443 = shalt.err (!%p1440_p11)
}
  0x2a   : > { %s1783_s11 = smov 4   ;;  %s1784_s20 = smov 64  }
  0x2b   : > { %1315 = dma.hbm_to_vmem [thread:$0]  (!%p1663_p2), %s271_s29, 128, %s273_s21, %s261_s23, %s1784_s20, %s1784_s20, %s1783_s11  }
  0x2c   : > { %284 = sbr.rel (%p1621_p8) target bundleno = 401 (0x191), region = 48  ;;  %s1683_s14 = sand.u32 (!%p1621_p8), 1, %s1521_s25  }
  0x2d   : > { %s1035_s19 = sshll.u32 (!%p1621_p8), %s1683_s14, 3  ;;  %s287_s1 = scalar_lea.sflag (!%p1621_p8), [#allocation3], %s1683_s14 }
  0x2e   : > { %s1687_s13 = scalar_lea.vmem (!%p1621_p8), [#allocation2], %s1035_s19 }
  0x31   : > { %1504 = dma.done.wait (%p1608_p4), %s287_s1, 128  }
  0x32   : > { %1506 = vsyncadd (%p1608_p4), %s287_s1, 4294967168 }
  0x33   : > { %1508 = dma.done.wait (%p45_p1), [#allocation6], 6144  }
  0x34   : > { %1510 = vsyncadd (%p45_p1), [#allocation6], 4294961152  ;;  %v1251_v0 = vld [vmem:[#allocation5 + $0x38] sm:$0xff]  ;;  %v1250_v3 = vld [vmem:[#allocation5 + $0x30] sm:$0xff]  ;;  %v334_v49 = vlaneseq  ;;  %v1535_v60 = vmov 0.0   ;;  %s1038_s17 = sshll.u32 %s1683_s14, 4 }
  0x35   : > { %v1267_v1 = vld [vmem:[#allocation5 + $0xb8] sm:$0xff]  ;;  %445 = vmatpush.bf16.msra.mxu0 %v1251_v0  ;;  %v1266_v4 = vld [vmem:[#allocation5 + $0xb0] sm:$0xff]  ;;  %v1249_v6 = vld [vmem:[#allocation5 + $0x28] sm:$0xff]  ;;  %s1292_s11 = sshll.u32 %s1599_s28, 4  ;;  %s919_s28 = scalar_lea.sflag [#allocation4], %s1683_s14 }
  0x36   : > { %v1259_v2 = vld [vmem:[#allocation5 + $0x78] sm:$0xff]  ;;  %541 = vmatpush.bf16.msra.mxu1 %v1267_v1  ;;  %v1258_v5 = vld [vmem:[#allocation5 + $0x70] sm:$0xff]  ;;  %v1265_v7 = vld [vmem:[#allocation5 + $0xa8] sm:$0xff]  ;;  %v1698_v50 = vshrl.u32 %v334_v49, 7  ;;  %s930_s1 = scalar_lea.hbm %s1773_s7, %s1292_s11  ;;  %s1479_s15 = scalar_lea.hbm %s1773_s7, 32 }
  0x37   : > { %617 = vmatpush.bf16.msra.mxu2 %v1259_v2  ;;  %v1257_v8 = vld [vmem:[#allocation5 + $0x68] sm:$0xff]  ;;  %v1275_v9 = vld [vmem:[#allocation7 + $0x38] sm:$0xff]  ;;  %v1248_v10 = vld [vmem:[#allocation5 + $0x20] sm:$0xff]  ;;  %s933_s12 = sshll.u32 %s930_s1, 4  ;;  %s934_s12 = int_to_ptr.hbm [resolvable:$true] %s933_s12 }
  0x38   : > { %v1264_v11 = vld [vmem:[#allocation5 + $0xa0] sm:$0xff]  ;;  %714 = vmatpush.bf16.msra.mxu3 %v1275_v9  ;;  %v1247_v13 = vld [vmem:[#allocation5 + $0x18] sm:$0xff]  ;;  %v1246_v16 = vld [vmem:[#allocation5 + $0x10] sm:$0xff]  ;;  %v341_v53 = vand.u32 15, %v1698_v50  ;;  %v336_v54 = vadd.s32 8, %v1698_v50  ;;  %vm557_vm1 = vcmp.lt.s32.totalorder %v1698_v50, 1 }
  0x39   : > { %446 = vmatpush.bf16.msra.mxu0 %v1250_v3  ;;  %v1256_v12 = vld [vmem:[#allocation5 + $0x60] sm:$0xff]  ;;  %v1263_v14 = vld [vmem:[#allocation5 + $0x98] sm:$0xff]  ;;  %v1262_v17 = vld [vmem:[#allocation5 + $0x90] sm:$0xff]  ;;  %vm564_vm2 = vcmp.lt.s32.totalorder %v1698_v50, 7  ;;  %s1473_s18 = sshra.s32 %s934_s12, 4  ;;  %s1474_s18 = int_to_ptr.hbm [resolvable:$true] %s1473_s18 }
  0x3a   : > { %542 = vmatpush.bf16.msra.mxu1 %v1266_v4  ;;  %v1255_v15 = vld [vmem:[#allocation5 + $0x58] sm:$0xff]  ;;  %v1254_v18 = vld [vmem:[#allocation5 + $0x50] sm:$0xff]  ;;  %v1245_v19 = vld [vmem:[#allocation5 + $0x8] sm:$0xff]  ;;  %vm361_vm0 = vcmp.ne.s32.totalorder %v341_v53, 0  ;;  %v348_v55 = vand.u32 15, %v336_v54  ;;  %s1475_s21 = scalar_lea.hbm %s1474_s18, 16  ;;  %p1480_p11 = scmp.lt.s32.totalorder %s1474_s18, %s1773_s7 }
  0x3b   : > { %618 = vmatpush.bf16.msra.mxu2 %v1258_v5  ;;  %v1261_v20 = vld [vmem:[#allocation5 + $0x88] sm:$0xff]  ;;  %v1244_v22 = vld [vmem:[#allocation5] sm:$0xff]  ;;  %v1291_v25 = vld [vmem:[#allocation7 + $0xb8] sm:$0xff]  ;;  %v1039_v61 = vsel %vm361_vm0, 1.0, %v1535_v60  ;;  %p1476_p1 = scmp.ne.s32.totalorder %s1474_s18, %s1475_s21  ;;  %p1481_p2 = scmp.lt.s32.totalorder %s1479_s15, %s1475_s21 }
  0x3c   : > { %v1253_v21 = vld [vmem:[#allocation5 + $0x48] sm:$0xff]  ;;  %v1260_v23 = vld [vmem:[#allocation5 + $0x80] sm:$0xff]  ;;  %v1283_v26 = vld [vmem:[#allocation7 + $0x78] sm:$0xff]  ;;  %vm368_vm3 = vcmp.ne.s32.totalorder %v348_v55, 15 }
  0x3d   : > { %447 = vmatpush.bf16.msra.mxu0 %v1249_v6  ;;  %v1252_v24 = vld [vmem:[#allocation5 + $0x40] sm:$0xff]  ;;  %v1243_v27 = vld [vmem:[%s1687_s13] sm:$0xff]  ;;  %v1273_v31 = vld [vmem:[#allocation7 + $0x28] sm:$0xff]  ;;  %v1040_v4 = vsel %vm368_vm3, 1.0, %v1535_v60  ;;  %s331_s13 = scalar_lea.vmem [#allocation8], %s1038_s17  ;;  %p1477_p4 = pnand %p1476_p1, %p1650_p3 }
  0x3e   : > { %543 = vmatpush.bf16.msra.mxu1 %v1265_v7  ;;  %v1274_v28 = vld [vmem:[#allocation7 + $0x30] sm:$0xff]  ;;  %v1289_v32 = vld [vmem:[#allocation7 + $0xa8] sm:$0xff]  ;;  %v1272_v34 = vld [vmem:[#allocation7 + $0x20] sm:$0xff]  ;;  %s931_s30 = sshll.u32 %s331_s13, 4  ;;  %p1482_p9 = por %p1481_p2, %p1480_p11  ;;  %s932_s30 = int_to_ptr.vmem [resolvable:$true] %s931_s30 }
  0x3f   : > { %619 = vmatpush.bf16.msra.mxu2 %v1257_v8  ;;  %v1290_v29 = vld [vmem:[#allocation7 + $0xb0] sm:$0xff]  ;;  %715 = vmatpush.bf16.msra.mxu3 %v1274_v28  ;;  %v1281_v33 = vld [vmem:[#allocation7 + $0x68] sm:$0xff]  ;;  %v1288_v35 = vld [vmem:[#allocation7 + $0xa0] sm:$0xff]  ;;  %p1478_p8 = pneg %p1477_p4 }
  0x40   : > { %v1282_v30 = vld [vmem:[#allocation7 + $0x70] sm:$0xff]  ;;  %v1280_v36 = vld [vmem:[#allocation7 + $0x60] sm:$0xff]  ;;  %v1271_v37 = vld [vmem:[#allocation7 + $0x18] sm:$0xff] }
  0x41   : > { %448 = vmatpush.bf16.msra.mxu0 %v1248_v10  ;;  %v1287_v38 = vld [vmem:[#allocation7 + $0x98] sm:$0xff]  ;;  %v1270_v40 = vld [vmem:[#allocation7 + $0x10] sm:$0xff]  ;;  %v1269_v43 = vld [vmem:[#allocation7 + $0x8] sm:$0xff]  ;;  %p1483_p10 = pnand %p1482_p9, %p1478_p8 }
  0x42   : > { %544 = vmatpush.bf16.msra.mxu1 %v1264_v11  ;;  %v1279_v39 = vld [vmem:[#allocation7 + $0x58] sm:$0xff]  ;;  %v1286_v41 = vld [vmem:[#allocation7 + $0x90] sm:$0xff]  ;;  %v1285_v44 = vld [vmem:[#allocation7 + $0x88] sm:$0xff] }
  0x43   : > { %620 = vmatpush.bf16.msra.mxu2 %v1256_v12  ;;  %716 = vmatpush.bf16.msra.mxu3 %v1273_v31  ;;  %v1278_v42 = vld [vmem:[#allocation7 + $0x50] sm:$0xff]  ;;  %v1277_v45 = vld [vmem:[#allocation7 + $0x48] sm:$0xff]  ;;  %v1268_v46 = vld [vmem:[#allocation7] sm:$0xff] }
  0x44   : > { %v1284_v47 = vld [vmem:[#allocation7 + $0x80] sm:$0xff]  ;;  %v1365_v6 = vld [vmem:[%s1768_s2] ss:$0 sm:$0xff] }
  0x45   : > { %449 = vmatpush.bf16.msra.mxu0 %v1247_v13  ;;  %v1276_v48 = vld [vmem:[#allocation7 + $0x40] sm:$0xff]  ;;  %v1366_v13 = vld [vmem:[%s1769_s3] ss:$0 sm:$0xff] }
  0x46   : > { %545 = vmatpush.bf16.msra.mxu1 %v1263_v14 }
  0x47   : > { %621 = vmatpush.bf16.msra.mxu2 %v1255_v15  ;;  %717 = vmatpush.bf16.msra.mxu3 %v1272_v34 }
  0x49   : > { %450 = vmatpush.bf16.msra.mxu0 %v1246_v16 }
  0x4a   : > { %546 = vmatpush.bf16.msra.mxu1 %v1262_v17 }
  0x4b   : > { %622 = vmatpush.bf16.msra.mxu2 %v1254_v18  ;;  %718 = vmatpush.bf16.msra.mxu3 %v1271_v37 }
  0x4d   : > { %451 = vmatpush.bf16.msra.mxu0 %v1245_v19 }
  0x4e   : > { %547 = vmatpush.bf16.msra.mxu1 %v1261_v20 }
  0x4f   : > { %623 = vmatpush.bf16.msra.mxu2 %v1253_v21  ;;  %719 = vmatpush.bf16.msra.mxu3 %v1270_v40  ;;  %v1367_v40 = vld [vmem:[%s1771_s5] ss:$0 sm:$0xff] }
  0x51   : > { %452 = vmatpush.bf16.msra.mxu0 %v1244_v22 }
  0x52   : > { %548 = vmatpush.bf16.msra.mxu1 %v1260_v23 }
  0x53   : > { %624 = vmatpush.bf16.msra.mxu2 %v1252_v24  ;;  %720 = vmatpush.bf16.msra.mxu3 %v1269_v43  ;;  %v1368_v43 = vld [vmem:[%s1772_s6] ss:$0 sm:$0xff] }
  0x54   : > { %453 = vmatmul.bf16.vlgmr.msra.gmra.mxu0 %v1243_v27 }
  0x55   : > { %810 = vmatpush.bf16.msrb.mxu0 %v1291_v25  ;;  %549 = vmatmul.bf16.vlgmr.msra.gmra.mxu1 %v1243_v27 }
  0x56   : > { %884 = vmatpush.bf16.msrb.mxu1 %v1283_v26  ;;  %625 = vmatmul.bf16.vlgmr.msra.gmra.mxu2 %v1243_v27 }
  0x57   : > { %721 = vmatpush.bf16.msra.mxu3 %v1268_v46 }
  0x59   : > { %811 = vmatpush.bf16.msrb.mxu0 %v1290_v29 }
  0x5a   : > { %885 = vmatpush.bf16.msrb.mxu1 %v1282_v30 }
  0x5d   : > { %812 = vmatpush.bf16.msrb.mxu0 %v1289_v32 }
  0x5e   : > { %886 = vmatpush.bf16.msrb.mxu1 %v1281_v33 }
  0x61   : > { %813 = vmatpush.bf16.msrb.mxu0 %v1288_v35 }
  0x62   : > { %887 = vmatpush.bf16.msrb.mxu1 %v1280_v36 }
  0x65   : > { %814 = vmatpush.bf16.msrb.mxu0 %v1287_v38 }
  0x66   : > { %888 = vmatpush.bf16.msrb.mxu1 %v1279_v39 }
  0x69   : > { %815 = vmatpush.bf16.msrb.mxu0 %v1286_v41 }
  0x6a   : > { %889 = vmatpush.bf16.msrb.mxu1 %v1278_v42 }
  0x6d   : > { %816 = vmatpush.bf16.msrb.mxu0 %v1285_v44 }
  0x6e   : > { %890 = vmatpush.bf16.msrb.mxu1 %v1277_v45 }
  0x71   : > { %817 = vmatpush.bf16.msrb.mxu0 %v1284_v47 }
  0x72   : > { %891 = vmatpush.bf16.msrb.mxu1 %v1276_v48 }
  0xd1   : > { %v454_v51 = vpop.f32.mrf.mxu0 }
  0xd2   : > { %v550_v52 = vpop.f32.mrf.mxu1  ;;  %v555_v59 = vrot.slane %v454_v51, 7 }
  0xd3   : > { %v562_v0 = vrot.slane %v550_v52, 1 }
  0xd9   : > { %v626_v56 = vpop.f32.mrf.mxu2  ;;  %v456_v57 = vpop.f32.mrf.mxu0 }
  0xda   : > { %v552_v58 = vpop.f32.mrf.mxu1  ;;  %v556_v62 = vrot.slane %v456_v57, 7 }
  0xdb   : > { %v563_v63 = vrot.slane %v552_v58, 1 }
  0xdc   : > { %v559_v1 = vsel %vm557_vm1, %v556_v62, %v555_v59  ;;  %v558_v8 = vsel %vm557_vm1, %v555_v59, %v556_v62 }
  0xdd   : > { %v560_v2 = vmul.f32 %v1039_v61, %v559_v1  ;;  %v566_v3 = vsel %vm564_vm2, %v563_v63, %v562_v0  ;;  %v565_v7 = vsel %vm564_vm2, %v562_v0, %v563_v63 }
  0xde   : > { %v568_v11 = vmul.f32 %v1040_v4, %v566_v3 }
  0xdf   : > { %v627_v5 = vadd.f32 %v626_v56, %v560_v2 }
  0xe1   : > { %v628_v9 = vpop.f32.mrf.mxu2  ;;  %v631_v10 = vadd.f32 %v627_v5, %v565_v7 }
  0xe2   : > { %v629_v12 = vadd.f32 %v628_v9, %v558_v8 }
  0xe3   : > { %v637_v15 = vmul.f32 %v1365_v6, %v631_v10 }
  0xe4   : > { %v632_v14 = vadd.f32 %v629_v12, %v568_v11 }
  0xe5   : > { %v643_v17 = vadd.f32 %v1366_v13, %v637_v15 }
  0xe6   : > { %v638_v16 = vmul.f32 %v1365_v6, %v632_v14 }
  0xe7   : > { %v645_v19 = vmul.f32 0.01, %v643_v17 }
  0xe8   : > { %v644_v18 = vadd.f32 %v1366_v13, %v638_v16 }
  0xe9   : > { %v647_v21 = vmax.f32 %v643_v17, %v645_v19 }
  0xea   : > { %v646_v20 = vmul.f32 0.01, %v644_v18 }
  0xec   : > { %v648_v22 = vmax.f32 %v644_v18, %v646_v20 }
  0xee   : > { %v649_v23 = vpack.c.bf16 %v648_v22, %v647_v21 }
  0xf0   : > { %722 = vmatmul.bf16.vlgmr.msra.gmra.mxu3 %v649_v23  ;;  %818 = vmatmul.bf16.vlgmr.msrb.gmra.mxu0 %v649_v23 }
  0xf1   : > { %892 = vmatmul.bf16.vlgmr.msrb.gmra.mxu1 %v649_v23 }
 0x16d   : > { %v819_v24 = vpop.f32.mrf.mxu0 }
 0x16e   : > { %v893_v26 = vpop.f32.mrf.mxu1  ;;  %v830_v29 = vrot.slane %v819_v24, 1 }
 0x173   : > { %v723_v25 = vpop.f32.mrf.mxu3 }
 0x174   : > { %v824_v31 = vrot.slane %v723_v25, 7 }
 0x175   : > { %v821_v27 = vpop.f32.mrf.mxu0 }
 0x176   : > { %v831_v28 = vrot.slane %v821_v27, 1  ;;  %v895_v34 = vpop.f32.mrf.mxu1 }
 0x178   : > { %v833_v32 = vsel %vm564_vm2, %v831_v28, %v830_v29  ;;  %v832_v44 = vsel %vm564_vm2, %v830_v29, %v831_v28 }
 0x179   : > { %v835_v37 = vmul.f32 %v1040_v4, %v833_v32 }
 0x17b   : > { %v725_v30 = vpop.f32.mrf.mxu3 }
 0x17c   : > { %v825_v33 = vrot.slane %v725_v30, 7 }
 0x17e   : > { %v826_v35 = vsel %vm557_vm1, %v824_v31, %v825_v33  ;;  %v827_v36 = vsel %vm557_vm1, %v825_v33, %v824_v31 }
 0x17f   : > { %v828_v38 = vmul.f32 %v1039_v61, %v827_v36  ;;  %v896_v39 = vadd.f32 %v895_v34, %v826_v35 }
 0x181   : > { %v894_v41 = vadd.f32 %v893_v26, %v828_v38  ;;  %v899_v42 = vadd.f32 %v896_v39, %v835_v37 }
 0x183   : > { %v898_v45 = vadd.f32 %v894_v41, %v832_v44  ;;  %v905_v46 = vmul.f32 %v1367_v40, %v899_v42 }
 0x185   : > { %v904_v47 = vmul.f32 %v1367_v40, %v898_v45  ;;  %v911_v48 = vadd.f32 %v1368_v43, %v905_v46 }
 0x187   : > { %v910_v49 = vadd.f32 %v1368_v43, %v904_v47  ;;  %v913_v51 = vmul.f32 0.01, %v911_v48 }
 0x189   : > { %v912_v52 = vmul.f32 0.01, %v910_v49  ;;  %v915_v53 = vmax.f32 %v911_v48, %v913_v51 }
 0x18b   : > { %v914_v50 = vmax.f32 %v910_v49, %v912_v52  ;;  %917 = vst [vmem:[%s331_s13 + $0x8] sm:$0xff] %v915_v53 }
 0x18d   : > { %916 = vst [vmem:[%s331_s13] sm:$0xff] %v914_v50 }
 0x18e   : > { %1486 = shalt.err (!%p1483_p10)
}
 0x18f   : > { %s1536_s14 = smov 128   ;;  %s1537_s11 = smov 8  }
 0x190   : > { %1303 = dma.vmem_to_hbm [thread:$0]  (%p1650_p3), %s932_s30, 256, %s934_s12, %s919_s28, %s1536_s14, %s1536_s14, %s1537_s11  }
 0x191 PF: > { %s948_s20 = sand.u32 1, %s1517_s24   ;;  %p1785_p12 = scmp.ge.s32.totalorder %s1529_s27, 2 }
 0x192   : > { %s949_s19 = scalar_lea.sflag [#allocation4], %s948_s20 }
 0x193   : > { %p1317_p13 = pnand %p1785_p12, %p1613_p6 }
 0x195   : > { %p1318_p0 = pneg %p1317_p13 }
 0x197   : > { %1512 = dma.done.wait (%p1318_p0), %s949_s19, 256  }
 0x198   : > { %1514 = vsyncadd (%p1318_p0), %s949_s19, 4294967040  ;;  %p21_p5 = scmp.ge.s32.totalorder %s1640_s22, 4   ;;  %s1786_s24 = smov %s1521_s25 }
 0x199   : > { %s1787_s25 = smov %s1525_s26  ;;  %s1788_s26 = smov %s1656_s10 }
 0x19a   : > { %s1789_s27 = smov %s1640_s22  ;;  %23 = sbr.rel (!%p21_p5) target bundleno = 8 (0x8), region = 105 }
 0x19f   :  { %955 = vsyncpa [#allocation3], 1 }
 0x1a0   :  { %957 = vsyncpa [#allocation3 + $0x1], 1 }
 0x1a1   :  { %958 = vsyncpa [#allocation6], 1 }
 0x1a2   :  { %959 = vsyncpa [#allocation4], 1 }
 0x1a3   :  { %961 = vsyncpa [#allocation4 + $0x1], 1 }

</bundles_post_ra>
